<compile_context>
chip_gen: v7x
topology: tpu7x:2x2x1
jax: 0.10.0
libtpu: 0.0.40
codegen_flags: <defaults>
</compile_context>

<pallas_src>
import jax
import jax.numpy as jnp
from jax.experimental import pallas as pl
from jax.experimental.pallas import tpu as pltpu

LANE = 128      # vreg lane width
SUBLANE = 8     # vreg sublane count (f32)


def _round_up(n, m):
    return ((n + m - 1) // m) * m


def mlp_kernel(x_ref, w1_ref, b1_ref, w2_ref, b2_ref, w3_ref, b3_ref, o_ref):
    """Fused fc1+ReLU -> fc2 -> fc3 -> sigmoid for one (TILE_B, ...) batch tile."""
    # Matmul inputs in bf16 (single-pass MXU), f32 accumulation.
    x = x_ref[...].astype(jnp.bfloat16)
    h1 = jnp.dot(x, w1_ref[...], preferred_element_type=jnp.float32)
    h1 = jnp.maximum(h1 + b1_ref[...], 0.0)           # bias + ReLU in f32

    h2 = jnp.dot(h1.astype(jnp.bfloat16), w2_ref[...],
                 preferred_element_type=jnp.float32)
    h2 = h2 + b2_ref[...]

    h3 = jnp.dot(h2.astype(jnp.bfloat16), w3_ref[...],
                 preferred_element_type=jnp.float32)
    h3 = h3 + b3_ref[...]

    # Numerically stable sigmoid: sigmoid(s) = 0.5 * (tanh(s/2) + 1).
    # tanh goes to the EUP; no exp overflow for large |s|, no approx recip.
    o_ref[...] = (0.5 * (jnp.tanh(0.5 * h3) + 1.0)).astype(o_ref.dtype)


def net_forward(x, w1, b1, w2, b2, w3, b3, *, tile_b=None):
    """x: (B, D_in) f32 or bf16.  w*: (in, out).  b*: (1, out).  Returns (B, C) f32."""
    B, d_in = x.shape
    h = w1.shape[1]
    c = w3.shape[1]

    # --- bf16 weights for the MXU, f32 biases for the VPU --------------------
    w1 = w1.astype(jnp.bfloat16)
    w2 = w2.astype(jnp.bfloat16)
    w3 = w3.astype(jnp.bfloat16)
    b1 = b1.astype(jnp.float32)
    b2 = b2.astype(jnp.float32)
    b3 = b3.astype(jnp.float32)

    # --- batch tiling ---------------------------------------------------------
    # Large tiles amortize the ~0.35 us per-grid-step overhead (VMEM headroom
    # is huge: weights ~10 KB resident, a 4096-row f32 x tile is 256 KiB).
    # Guarantee >=2 grid steps when B allows it so v7x's 2 TCs both get work.
    if tile_b is None:
        b8 = _round_up(B, SUBLANE)
        n_tiles = pl.cdiv(b8, 4096)
        if b8 >= 2 * SUBLANE:
            n_tiles = max(n_tiles, 2)
        tile_b = pl.cdiv(b8, n_tiles)
    tile_b = max(SUBLANE, _round_up(min(tile_b, _round_up(B, SUBLANE)), SUBLANE))
    # No wrapper-side jnp.pad: ragged last tile is masked by Pallas (all ops
    # are row-independent, so out-of-bounds rows never contaminate valid rows).
    grid = (pl.cdiv(B, tile_b),)

    # --- cost hint for the XLA scheduler (unpadded byte counts) --------------
    flops = 2 * B * (d_in * h + h * h + h * c)
    bytes_accessed = (
        B * d_in * x.dtype.itemsize                         # x in
        + (w1.size + w2.size + w3.size) * 2                 # bf16 weights
        + (b1.size + b2.size + b3.size) * 4                 # f32 biases
        + B * c * 4                                         # out (f32)
    )
    cost = pl.CostEstimate(flops=flops,
                           transcendentals=B * c,
                           bytes_accessed=bytes_accessed)

    # Parameters: full-array block, constant index_map -> resident in VMEM.
    resident = lambda a: pl.BlockSpec(a.shape, lambda i: (0, 0))

    out = pl.pallas_call(
        mlp_kernel,
        out_shape=jax.ShapeDtypeStruct((B, c), jnp.float32),
        grid_spec=pltpu.PrefetchScalarGridSpec(
            num_scalar_prefetch=0,
            grid=grid,
            in_specs=[
                pl.BlockSpec((tile_b, d_in), lambda i: (i, 0)),   # x: pipelined tiles
                resident(w1), resident(b1),
                resident(w2), resident(b2),
                resident(w3), resident(b3),
            ],
            out_specs=pl.BlockSpec((tile_b, c), lambda i: (i, 0)),
        ),
        compiler_params=pltpu.CompilerParams(
            dimension_semantics=("parallel",),   # shard batch tiles across v7x's 2 TCs
        ),
        cost_estimate=cost,
    )(x, w1, b1, w2, b2, w3, b3)

    return out


if __name__ == "__main__":
    # Shapes implied by Net(input_size, hidden_size, num_classes)
    batch = 8
    input_size = 16
    hidden_size = 32
    num_classes = 8

    key = jax.random.PRNGKey(0)
    kx, k1, k2, k3, k4, k5, k6 = jax.random.split(key, 7)

    x = jax.random.normal(kx, (batch, input_size), jnp.float32)
    # Deterministic synthetic parameters, (in, out) layout.
    w1 = jax.random.normal(k1, (input_size, hidden_size), jnp.float32) * 0.1
    b1 = jax.random.normal(k2, (1, hidden_size), jnp.float32) * 0.1
    w2 = jax.random.normal(k3, (hidden_size, hidden_size), jnp.float32) * 0.1
    b2 = jax.random.normal(k4, (1, hidden_size), jnp.float32) * 0.1
    w3 = jax.random.normal(k5, (hidden_size, num_classes), jnp.float32) * 0.1
    b3 = jax.random.normal(k6, (1, num_classes), jnp.float32) * 0.1

    out = net_forward(x, w1, b1, w2, b2, w3, b3)
    jax.block_until_ready(out)

    # Reference in plain JAX with the same matmul numerics (bf16 inputs,
    # f32 accumulation) and exact sigmoid.
    bf = lambda a: a.astype(jnp.bfloat16)
    hh = jnp.maximum(jnp.dot(bf(x), bf(w1), preferred_element_type=jnp.float32) + b1, 0.0)
    hh = jnp.dot(bf(hh), bf(w2), preferred_element_type=jnp.float32) + b2
    hh = jnp.dot(bf(hh), bf(w3), preferred_element_type=jnp.float32) + b3
    ref = 1.0 / (1.0 + jnp.exp(-hh))

    assert out.shape == (batch, num_classes)
    assert jnp.allclose(out, ref, atol=2e-3), "mismatch vs reference"

    # TODO(synk): Net.saveWeights (torch.save) is host-side I/O, not a kernel op.
    print("KERNEL_OK")
</pallas_src>

<mosaic_0001>
module attributes {stable_mosaic.version = 11 : i64} {
  func.func @mlp_kernel(%arg0: i32, %arg1: memref<8x16xf32, #tpu.memory_space<vmem>>, %arg2: memref<16x32xbf16, #tpu.memory_space<vmem>>, %arg3: memref<1x32xf32, #tpu.memory_space<vmem>>, %arg4: memref<32x32xbf16, #tpu.memory_space<vmem>>, %arg5: memref<1x32xf32, #tpu.memory_space<vmem>>, %arg6: memref<32x8xbf16, #tpu.memory_space<vmem>>, %arg7: memref<1x8xf32, #tpu.memory_space<vmem>>, %arg8: memref<8x8xf32, #tpu.memory_space<vmem>>) attributes {dimension_semantics = [#tpu.dimension_semantics<parallel>], iteration_bounds = array<i64: 1>, scalar_prefetch = 0 : i64, scratch_operands = 0 : i64, tpu.core_type = #tpu.core_type<tc>, window_params = [{transform_indices = @transform_0, window_bounds = array<i64: 8, 16>}, {pipeline_mode = #tpu.pipeline_mode<synchronous>, transform_indices = @transform_1, window_bounds = array<i64: 16, 32>}, {pipeline_mode = #tpu.pipeline_mode<synchronous>, transform_indices = @transform_2, window_bounds = array<i64: 1, 32>}, {pipeline_mode = #tpu.pipeline_mode<synchronous>, transform_indices = @transform_3, window_bounds = array<i64: 32, 32>}, {pipeline_mode = #tpu.pipeline_mode<synchronous>, transform_indices = @transform_4, window_bounds = array<i64: 1, 32>}, {pipeline_mode = #tpu.pipeline_mode<synchronous>, transform_indices = @transform_5, window_bounds = array<i64: 32, 8>}, {pipeline_mode = #tpu.pipeline_mode<synchronous>, transform_indices = @transform_6, window_bounds = array<i64: 1, 8>}, {transform_indices = @transform_7, window_bounds = array<i64: 8, 8>}]} {
    %c0 = arith.constant 0 : index
    %c0_0 = arith.constant 0 : index
    %0 = vector.load %arg1[%c0, %c0_0] : memref<8x16xf32, #tpu.memory_space<vmem>>, vector<8x16xf32>
    %1 = arith.truncf %0 : vector<8x16xf32> to vector<8x16xbf16>
    %c0_1 = arith.constant 0 : index
    %c0_2 = arith.constant 0 : index
    %2 = vector.load %arg2[%c0_1, %c0_2] : memref<16x32xbf16, #tpu.memory_space<vmem>>, vector<16x32xbf16>
    %cst = arith.constant dense<0.000000e+00> : vector<8x32xf32>
    %3 = tpu.matmul %1, %2, %cst {dimension_numbers = #tpu.dot_dimension_numbers<[1], [0], [0], [1], [0, 0, 1, 1], [], []>} : vector<8x16xbf16>, vector<16x32xbf16>, vector<8x32xf32> -> vector<8x32xf32>
    %c0_3 = arith.constant 0 : index
    %c0_4 = arith.constant 0 : index
    %4 = vector.load %arg3[%c0_3, %c0_4] : memref<1x32xf32, #tpu.memory_space<vmem>>, vector<1x32xf32>
    %5 = vector.broadcast %4 : vector<1x32xf32> to vector<8x32xf32>
    %6 = arith.addf %3, %5 : vector<8x32xf32>
    %cst_5 = arith.constant 0.000000e+00 : f32
    %7 = vector.broadcast %cst_5 : f32 to vector<8x32xf32>
    %8 = arith.maximumf %6, %7 : vector<8x32xf32>
    %9 = arith.truncf %8 : vector<8x32xf32> to vector<8x32xbf16>
    %c0_6 = arith.constant 0 : index
    %c0_7 = arith.constant 0 : index
    %10 = vector.load %arg4[%c0_6, %c0_7] : memref<32x32xbf16, #tpu.memory_space<vmem>>, vector<32x32xbf16>
    %cst_8 = arith.constant dense<0.000000e+00> : vector<8x32xf32>
    %11 = tpu.matmul %9, %10, %cst_8 {dimension_numbers = #tpu.dot_dimension_numbers<[1], [0], [0], [1], [0, 0, 1, 1], [], []>} : vector<8x32xbf16>, vector<32x32xbf16>, vector<8x32xf32> -> vector<8x32xf32>
    %c0_9 = arith.constant 0 : index
    %c0_10 = arith.constant 0 : index
    %12 = vector.load %arg5[%c0_9, %c0_10] : memref<1x32xf32, #tpu.memory_space<vmem>>, vector<1x32xf32>
    %13 = vector.broadcast %12 : vector<1x32xf32> to vector<8x32xf32>
    %14 = arith.addf %11, %13 : vector<8x32xf32>
    %15 = arith.truncf %14 : vector<8x32xf32> to vector<8x32xbf16>
    %c0_11 = arith.constant 0 : index
    %c0_12 = arith.constant 0 : index
    %16 = vector.load %arg6[%c0_11, %c0_12] : memref<32x8xbf16, #tpu.memory_space<vmem>>, vector<32x8xbf16>
    %cst_13 = arith.constant dense<0.000000e+00> : vector<8x8xf32>
    %17 = tpu.matmul %15, %16, %cst_13 {dimension_numbers = #tpu.dot_dimension_numbers<[1], [0], [0], [1], [0, 0, 1, 1], [], []>} : vector<8x32xbf16>, vector<32x8xbf16>, vector<8x8xf32> -> vector<8x8xf32>
    %c0_14 = arith.constant 0 : index
    %c0_15 = arith.constant 0 : index
    %18 = vector.load %arg7[%c0_14, %c0_15] : memref<1x8xf32, #tpu.memory_space<vmem>>, vector<1x8xf32>
    %19 = vector.broadcast %18 : vector<1x8xf32> to vector<8x8xf32>
    %20 = arith.addf %17, %19 : vector<8x8xf32>
    %cst_16 = arith.constant 5.000000e-01 : f32
    %21 = vector.broadcast %cst_16 : f32 to vector<8x8xf32>
    %22 = arith.mulf %21, %20 : vector<8x8xf32>
    %23 = math.tanh %22 : vector<8x8xf32>
    %cst_17 = arith.constant 1.000000e+00 : f32
    %24 = vector.broadcast %cst_17 : f32 to vector<8x8xf32>
    %25 = arith.addf %23, %24 : vector<8x8xf32>
    %cst_18 = arith.constant 5.000000e-01 : f32
    %26 = vector.broadcast %cst_18 : f32 to vector<8x8xf32>
    %27 = arith.mulf %26, %25 : vector<8x8xf32>
    %c0_19 = arith.constant 0 : index
    %c0_20 = arith.constant 0 : index
    %28 = vector.load %arg8[%c0_19, %c0_20] : memref<8x8xf32, #tpu.memory_space<vmem>>, vector<8x8xf32>
    tpu.vector_store %arg8[%c0_19, %c0_20], %27 {strides = array<i32>} : memref<8x8xf32, #tpu.memory_space<vmem>>, vector<8x8xf32>,
    return
  }
  func.func @transform_0(%arg0: i32) -> (i32, i32) {
    %c0_i32 = arith.constant 0 : i32
    %c0_i32_0 = arith.constant 0 : i32
    return %arg0, %c0_i32 : i32, i32
  }
  func.func @transform_1(%arg0: i32) -> (i32, i32) {
    %c0_i32 = arith.constant 0 : i32
    %c0_i32_0 = arith.constant 0 : i32
    %c0_i32_1 = arith.constant 0 : i32
    return %c0_i32, %c0_i32_0 : i32, i32
  }
  func.func @transform_2(%arg0: i32) -> (i32, i32) {
    %c0_i32 = arith.constant 0 : i32
    %c0_i32_0 = arith.constant 0 : i32
    %c0_i32_1 = arith.constant 0 : i32
    return %c0_i32, %c0_i32_0 : i32, i32
  }
  func.func @transform_3(%arg0: i32) -> (i32, i32) {
    %c0_i32 = arith.constant 0 : i32
    %c0_i32_0 = arith.constant 0 : i32
    %c0_i32_1 = arith.constant 0 : i32
    return %c0_i32, %c0_i32_0 : i32, i32
  }
  func.func @transform_4(%arg0: i32) -> (i32, i32) {
    %c0_i32 = arith.constant 0 : i32
    %c0_i32_0 = arith.constant 0 : i32
    %c0_i32_1 = arith.constant 0 : i32
    return %c0_i32, %c0_i32_0 : i32, i32
  }
  func.func @transform_5(%arg0: i32) -> (i32, i32) {
    %c0_i32 = arith.constant 0 : i32
    %c0_i32_0 = arith.constant 0 : i32
    %c0_i32_1 = arith.constant 0 : i32
    return %c0_i32, %c0_i32_0 : i32, i32
  }
  func.func @transform_6(%arg0: i32) -> (i32, i32) {
    %c0_i32 = arith.constant 0 : i32
    %c0_i32_0 = arith.constant 0 : i32
    %c0_i32_1 = arith.constant 0 : i32
    return %c0_i32, %c0_i32_0 : i32, i32
  }
  func.func @transform_7(%arg0: i32) -> (i32, i32) {
    %c0_i32 = arith.constant 0 : i32
    %c0_i32_0 = arith.constant 0 : i32
    return %arg0, %c0_i32 : i32, i32
  }
}

</mosaic_0001>

<bundles_post_ra>
// kernel: tpu_custom_call.1
= control target key start
LH: loop header
LB: loop body
LE: loop exit
PB: predicated region body
PF: predicated region fallthrough
CT: control target
= control target key end

     0   :  { %12 = vsyncpa [#allocation3], 0  ;;  %s456_s0 = inlined_call_operand.vmem [shape: f32[8,16], index: 0, kind: input, shape index: {}]   ;;  %s457_s1 = inlined_call_operand.hbm [shape: bf16[16,32], index: 1, kind: input, shape index: {}]   ;;  %s458_s2 = inlined_call_operand.vmem [shape: f32[1,32], index: 2, kind: input, shape index: {}]   ;;  %s459_s3 = inlined_call_operand.vmem [shape: bf16[32,32], index: 3, kind: input, shape index: {}]   ;;  %s460_s4 = inlined_call_operand.vmem [shape: f32[1,32], index: 4, kind: input, shape index: {}]   ;;  %s461_s5 = inlined_call_operand.vmem [shape: bf16[32,8], index: 5, kind: input, shape index: {}]   ;;  %s462_s6 = inlined_call_operand.vmem [shape: f32[1,8], index: 6, kind: input, shape index: {}]   ;;  %s463_s7 = inlined_call_operand.hbm [shape: f32[8,8], index: 7, kind: output, shape index: {}]  }
   0x1   :  { %13 = vsyncpa [#allocation4], 0  ;;  %s362_s24 = smov [#allocation2]   ;;  %s314_s28 = scalar_lea.hbm %s457_s1, 128 }
   0x2   :  { %s21_s25 = sshll.u32 %s362_s24, 4  ;;  %p315_p0 = scmp.ne.s32.totalorder %s457_s1, %s314_s28  ;;  %s22_s25 = int_to_ptr.vmem [resolvable:$true] %s21_s25 }
   0x3   :  { %p318_p1 = scmp.lt.u32.totalorder %s314_s28, %s457_s1 }
   0x5   :  { %p320_p2 = pnand %p318_p1, %p315_p0 }
   0x7   :  { %323 = shalt.err (!%p320_p2)
}
   0x8   :  { %s324_s10 = scalar_lea.vmem %s22_s25, 128  ;;  %p329_p4 = scmp.lt.s32.totalorder %s22_s25, %s22_s25 }
   0x9   :  { %p325_p3 = scmp.ne.s32.totalorder %s22_s25, %s324_s10  ;;  %p330_p5 = scmp.lt.s32.totalorder %s324_s10, %s324_s10 }
   0xb   :  { %p331_p6 = por %p330_p5, %p329_p4 }
   0xd   :  { %p332_p7 = pnand %p331_p6, %p325_p3 }
   0xf   :  { %335 = shalt.err (!%p332_p7)
}
  0x10   :  { %s363_s11 = smov 64   ;;  %s364_s12 = smov 4  }
  0x11   :  { %27 = dma.hbm_to_vmem [thread:$0]  %s457_s1, 128, %s22_s25, [#allocation3], %s363_s11, %s363_s11, %s364_s12  }
  0x12   :  { %358 = dma.done.wait [#allocation3], 128  }
  0x13   :  { %359 = vsyncadd [#allocation3], 4294967168  ;;  %v365_v0 = vmov 0.0   ;;  %vm366_vm0 = vmmov 0   ;;  %v307_v1 = vld [vmem:[#allocation2] sm:$0xff]   ;;  %vm59_vm1 = vcmask 130048  }
  0x14   :  { %279 = vmatprep.subr.bf16.mxu0 %v365_v0  ;;  %281 = vmatprep.mubr.msk.bf16.mxu0 %vm366_vm0, %v365_v0  ;;  %v42_v2 = vld [vmem:[%s456_s0] sm:$0xff]  ;;  %v309_v5 = vld [vmem:[%s459_s3 + $0x8] sm:$0xff]   ;;  %vm128_vm2 = vcmask 261120   ;;  %vm243_vm3 = vcmask 64512  }
  0x15   :  { %285 = vmatprep.subr.bf16.mxu1 %v365_v0  ;;  %289 = vmatprep.mubr.msk.bf16.mxu1 %vm366_vm0, %v365_v0  ;;  %v43_v3 = vpack.c.bf16 %v42_v2, %v42_v2  ;;  %v308_v4 = vld [vmem:[%s459_s3] sm:$0xff]   ;;  %v311_v15 = vld [vmem:[%s461_s5 + $0x8] sm:$0xff]  }
  0x16   :  { %280 = vmatpush3.bf16.msra.mxu0 %v307_v1  ;;  %286 = vmatpush3.bf16.msra.mxu1 %v308_v4  ;;  %v310_v6 = vld [vmem:[%s461_s5] sm:$0xff]  }
  0x17   :  { %293 = vmatprep.subr.bf16.mxu0 %v365_v0  ;;  %287 = vmatprep.subr.bf16.mxu1 %v365_v0  ;;  %v260_v7 = vld [vmem:[%s458_s2] ss:$0 sm:$0xff] }
  0x18   :  { %v263_v16 = vld [vmem:[%s460_s4] ss:$0 sm:$0xff]  ;;  %s367_s4 = smov [#allocation5]  }
  0x19   :  { %282 = vmatmul.mubr.msk.bf16.vlgmr.msra.gmra.mrb[0].mxu0 %vm59_vm1, %v43_v3  ;;  %v267_v23 = vld [vmem:[%s462_s6] ss:$0 sm:$0xff]  ;;  %s251_s5 = sshll.u32 %s367_s4, 4  ;;  %s252_s5 = int_to_ptr.vmem [resolvable:$true] %s251_s5 }
  0x1a   :  { %297 = vmatprep.mubr.msk.bf16.mxu0 %vm366_vm0, %v365_v0  ;;  %288 = vmatpush3.bf16.msra.mxu1 %v309_v5  ;;  %s336_s27 = scalar_lea.vmem %s252_s5, 128  ;;  %p341_p9 = scmp.lt.s32.totalorder %s252_s5, %s252_s5 }
  0x1b   :  { %294 = vmatpush3.bf16.msra.mxu0 %v310_v6  ;;  %p337_p8 = scmp.ne.s32.totalorder %s252_s5, %s336_s27  ;;  %p342_p10 = scmp.lt.s32.totalorder %s336_s27, %s336_s27 }
  0x1c   :  { %295 = vmatprep.subr.bf16.mxu0 %v365_v0 }
  0x1d   :  { %p343_p11 = por %p342_p10, %p341_p9 }
  0x1f   :  { %296 = vmatpush3.bf16.msra.mxu0 %v311_v15  ;;  %p344_p12 = pnand %p343_p11, %p337_p8 }
  0xec   :  { %v97_v8 = vpop.f32.mrb[0].mxu0 }
  0xed   :  { %v98_v9 = vadd.f32 %v260_v7, %v97_v8  ;;  %v283_v10 = vpop.f32.mrb[1].mxu0 }
  0xee   :  { %v100_v11 = vpop.f32.mrb[2].mxu0 }
  0xef   :  { %v103_v12 = vmax.f32 %v98_v9, 0.0  ;;  %v284_v13 = vpop.f32.mrb[3].mxu0 }
  0xf1   :  { %v104_v14 = vpack.c.bf16 %v103_v12, %v103_v12 }
  0xf3   :  { %290 = vmatmul.mubr.msk.bf16.vlgmr.msra.gmra.mrb[0].mxu1 %vm128_vm2, %v104_v14 }
 0x1c6   :  { %v166_v17 = vpop.f32.mrb[0].mxu1 }
 0x1c7   :  { %v167_v18 = vadd.f32 %v263_v16, %v166_v17  ;;  %v291_v19 = vpop.f32.mrb[1].mxu1 }
 0x1c8   :  { %v169_v20 = vpop.f32.mrb[2].mxu1 }
 0x1c9   :  { %v172_v21 = vpack.c.bf16 %v167_v18, %v167_v18  ;;  %v292_v22 = vpop.f32.mrb[3].mxu1 }
 0x1cb   :  { %298 = vmatmul.mubr.msk.bf16.vlgmr.msra.gmra.mrb[4].mxu0 %vm128_vm2, %v172_v21 }
 0x29e   :  { %v233_v24 = vpop.f32.mrb[4].mxu0 }
 0x29f   :  { %v234_v25 = vadd.f32 %v267_v23, %v233_v24  ;;  %v299_v26 = vpop.f32.mrb[5].mxu0 }
 0x2a0   :  { %v236_v27 = vpop.f32.mrb[6].mxu0 }
 0x2a1   :  { %v239_v28 = vmul.f32 0.5, %v234_v25  ;;  %v300_v29 = vpop.f32.mrb[7].mxu0 }
 0x2a3   :  { %312 = vtanh.f32 %v239_v28 }
 0x2ad   :  { %v313_v30 = vpop.eup %312 }
 0x2ae   :  { %v241_v31 = vadd.f32 1.0, %v313_v30 }
 0x2b0   :  { %v242_v32 = vmul.f32 0.5, %v241_v31 }
 0x2b2   :  { %244 = vst.msk [vmem:[#allocation5] sm:$0xff] %vm243_vm3, %v242_v32 }
 0x2b3   :  { %347 = shalt.err (!%p344_p12)
}
 0x2b4   :  { %s348_s29 = scalar_lea.hbm %s463_s7, 128 }
 0x2b5   :  { %p349_p13 = scmp.ne.s32.totalorder %s463_s7, %s348_s29  ;;  %p352_p0 = scmp.lt.u32.totalorder %s348_s29, %s463_s7 }
 0x2b7   :  { %p354_p1 = pnand %p352_p0, %p349_p13 }
 0x2b9   :  { %357 = shalt.err (!%p354_p1)
}
 0x2ba   :  { %254 = dma.vmem_to_hbm [thread:$0]  %s252_s5, 128, %s463_s7, [#allocation4]  }
 0x2bb   :  { %360 = dma.done.wait [#allocation4], 128  }
 0x2bc   :  { %361 = vsyncadd [#allocation4], 4294967168 }
 0x2bd   :  { %258 = vsyncpa [#allocation3], 1 }
 0x2be   :  { %259 = vsyncpa [#allocation4], 1 }

</bundles_post_ra>
